<compile_context>
chip_gen: v6e
topology: v6e:2x2x1
jax: 0.10.0
libtpu: 0.0.40
codegen_flags: <defaults>
</compile_context>

<pallas_src>
import jax
import jax.numpy as jnp
from jax.experimental import pallas as pl
from jax.experimental.pallas import tpu as pltpu

NUM_CLASSES = 7  # class codes 100..700 -> indices 0..6


# ----------------------------------------------------------------------------
# Single-instance scalar-path kernel: one (19,) SMEM operand, SMEM scalar out.
# ----------------------------------------------------------------------------
def _wmse_scalar_kernel(d_ref, out_ref):
    # d_ref:   (19,) f32 SMEM = [ inputs(6) | targets(6) | class_weights(7) ]
    # out_ref: (1,)  f32 SMEM = scalar loss
    X, T, W = 0, 6, 12

    def x(i):
        return d_ref[X + i]

    def t_long(i):
        # targets.long(): truncation toward zero.
        return d_ref[T + i].astype(jnp.int32).astype(jnp.float32)

    # Squared errors of the two sensor columns for both samples.
    d00 = x(0) - t_long(0)   # sample 0, col 0
    d01 = x(1) - t_long(1)   # sample 0, col 1
    d10 = x(3) - t_long(3)   # sample 1, col 0
    d11 = x(4) - t_long(4)   # sample 1, col 1

    # Anomaly (third-column) differences.
    a0 = x(2) - t_long(2)
    a1 = x(5) - t_long(5)

    # Class code (exact multiple of 100 in [100, 700]) -> weight index 0..6.
    # Multiply-by-reciprocal + round instead of a scalar integer divide; exact
    # for the valid codes (non-multiples of 100 are out of contract).
    idx0 = (d_ref[T + 2] * 0.01 + 0.5).astype(jnp.int32) - 1
    idx1 = (d_ref[T + 5] * 0.01 + 0.5).astype(jnp.int32) - 1
    w0 = d_ref[W + idx0]     # dynamic scalar SMEM gather
    w1 = d_ref[W + idx1]

    # PyTorch's (B,)*(B,2) broadcast (B==2 only): weight j scales column j.
    sensors_mean = (w0 * (d00 * d00 + d10 * d10) + w1 * (d01 * d01 + d11 * d11)) * 0.25
    anomaly_mean = (w0 * a0 * a0 + w1 * a1 * a1) * 0.5
    out_ref[0] = sensors_mean + anomaly_mean


def weighted_mse_loss(inputs, targets, weights, *, use_pallas=True):
    """Single-instance forward.  inputs/targets (2, 3) f32, weights (7,) f32 -> scalar."""
    B, C = inputs.shape
    assert C == 3
    assert B == 2, "WeightedMSELoss's (B,) * (B, 2) broadcast requires batch == 2"
    assert weights.shape == (NUM_CLASSES,)

    if not use_pallas:
        # Highest-value path for a single ~20-FLOP instance: let XLA fuse the
        # scalar math into the surrounding graph (no custom-call launch).
        return _reference_single(inputs.astype(jnp.float32),
                                 targets.astype(jnp.float32),
                                 weights.astype(jnp.float32))

    # One concatenated SMEM operand -> one argument DMA instead of three.
    packed = jnp.concatenate([
        inputs.astype(jnp.float32).reshape(-1),   # 6
        targets.astype(jnp.float32).reshape(-1),  # 6
        weights.astype(jnp.float32).reshape(-1),  # 7
    ])                                             # (19,)

    smem = pl.BlockSpec(memory_space=pltpu.MemorySpace.SMEM)
    out = pl.pallas_call(
        _wmse_scalar_kernel,
        out_shape=jax.ShapeDtypeStruct((1,), jnp.float32),
        in_specs=[smem],
        out_specs=smem,
    )(packed)
    return out[0]


# ----------------------------------------------------------------------------
# Batched lane-dense kernel: N independent (2,3) loss instances on the lanes.
# ----------------------------------------------------------------------------
def _wmse_batched_kernel(x_ref, t_ref, w_ref, o_ref):
    # x_ref, t_ref: (6, TN) f32 — row r = flattened (2,3) entry r per instance
    #               rows: [s0c0, s0c1, s0c2, s1c0, s1c1, s1c2]
    # w_ref:        (2, TN) f32 — rows: [w0, w1] (gathered in the wrapper)
    # o_ref:        (1, TN) f32 — per-instance loss (lane-dense output)
    x = x_ref[...]                                           # (6, TN) f32
    t = t_ref[...].astype(jnp.int32).astype(jnp.float32)     # targets.long()
    diff = x - t
    sq = diff * diff                                         # VPU, f32 on all gens

    w0 = w_ref[0:1, :]                                       # (1, TN)
    w1 = w_ref[1:2, :]

    # sensors: column 0 (rows 0,3) weighted by w0, column 1 (rows 1,4) by w1.
    sensors = (w0 * (sq[0:1, :] + sq[3:4, :]) + w1 * (sq[1:2, :] + sq[4:5, :])) * 0.25
    # anomaly: sample 0 (row 2) weighted by w0, sample 1 (row 5) by w1.
    anomaly = (w0 * sq[2:3, :] + w1 * sq[5:6, :]) * 0.5
    o_ref[...] = sensors + anomaly


def weighted_mse_loss_batched(inputs, targets, weights, *, block_n=512):
    """Batched forward: inputs/targets (N, 2, 3) f32, weights (7,) f32 -> (N,) losses."""
    assert block_n % 128 == 0
    N = inputs.shape[0]
    assert inputs.shape[1:] == (2, 3) and targets.shape == inputs.shape
    assert weights.shape == (NUM_CLASSES,)

    inputs = inputs.astype(jnp.float32)
    targets = targets.astype(jnp.float32)
    weights = weights.astype(jnp.float32)

    # Hoisted class-weight gather (trivial fused XLA op; no in-kernel gather).
    idx = targets[:, :, 2].astype(jnp.int32) // 100 - 1      # (N, 2), exact int semantics
    sw = jnp.take(weights, idx, axis=0)                      # (N, 2) -> [w0, w1] per instance

    # Lane-dense layout: instance axis last (lanes), operand columns on sublanes.
    x_cols = inputs.reshape(N, 6).T                          # (6, N)
    t_cols = targets.reshape(N, 6).T                         # (6, N)
    w_cols = sw.T                                            # (2, N)

    # Tile the lane axis; working set per block is (6+6+2+1)*tn*4*2 bytes —
    # tens of KB at tn=512, far under v7x's 32 MiB scoped / 64 MiB physical VMEM.
    tn = min(block_n, ((N + 127) // 128) * 128)
    n_pad = ((N + tn - 1) // tn) * tn
    pad = n_pad - N
    if pad:
        x_cols = jnp.pad(x_cols, ((0, 0), (0, pad)))
        t_cols = jnp.pad(t_cols, ((0, 0), (0, pad)))
        w_cols = jnp.pad(w_cols, ((0, 0), (0, pad)))         # padded lanes -> loss 0

    out = pl.pallas_call(
        _wmse_batched_kernel,
        out_shape=jax.ShapeDtypeStruct((1, n_pad), jnp.float32),
        grid_spec=pltpu.PrefetchScalarGridSpec(
            num_scalar_prefetch=0,
            grid=(n_pad // tn,),
            in_specs=[
                pl.BlockSpec((6, tn), lambda i: (0, i)),
                pl.BlockSpec((6, tn), lambda i: (0, i)),
                pl.BlockSpec((2, tn), lambda i: (0, i)),
            ],
            out_specs=pl.BlockSpec((1, tn), lambda i: (0, i)),
        ),
        compiler_params=pltpu.CompilerParams(
            # Batch axis is embarrassingly parallel: lets v7x's 2 TensorCores
            # split it; harmless no-op on the single-TC v5e/v6e.
            dimension_semantics=("parallel",)),
    )(x_cols, t_cols, w_cols)
    return out[0, :N]


# ----------------------------------------------------------------------------
# Pure-JAX reference (mirrors the PyTorch forward exactly, B == 2 quirk incl.).
# ----------------------------------------------------------------------------
def _reference_single(inputs, targets, weights):
    t_i = targets.astype(jnp.int32)
    t_l = t_i.astype(jnp.float32)
    fs_in, fs_tg = inputs[:, :2], t_l[:, :2]
    third_in, third_tg = inputs[:, 2], t_l[:, 2]
    idx = t_i[:, 2] // 100 - 1
    sw = weights[idx]                                        # (B,)
    sensors = jnp.mean(sw * (fs_in - fs_tg) ** 2)            # same B==2 broadcast as PyTorch
    anomaly = jnp.mean(sw * (third_in - third_tg) ** 2)
    return sensors + anomaly


if __name__ == "__main__":
    key = jax.random.PRNGKey(0)
    weights = jnp.array([1.0, 2.0, 0.5, 1.5, 3.0, 0.75, 1.25], dtype=jnp.float32)

    # --- single (2, 3) instance (module-spec shapes) -------------------------
    k1, k2, k3, k4 = jax.random.split(key, 4)
    B = 2
    inputs = jax.random.normal(k1, (B, 3), dtype=jnp.float32) * 2.0
    fs_targets = jax.random.randint(k2, (B, 2), minval=-3, maxval=4).astype(jnp.float32)
    class_codes = (jax.random.randint(k3, (B, 1), minval=1, maxval=8) * 100).astype(jnp.float32)
    targets = jnp.concatenate([fs_targets, class_codes], axis=1)

    loss = weighted_mse_loss(inputs, targets, weights)       # Pallas scalar path
    jax.block_until_ready(loss)
    ref = _reference_single(inputs, targets, weights)
    assert jnp.allclose(loss, ref, atol=1e-5, rtol=1e-5), (loss, ref)

    fused = weighted_mse_loss(inputs, targets, weights, use_pallas=False)
    assert jnp.allclose(fused, ref, atol=1e-6, rtol=1e-6), (fused, ref)

    # --- batched lane-dense variant: N stacked (2, 3) instances --------------
    N = 1024
    kb1, kb2, kb3 = jax.random.split(k4, 3)
    b_inputs = jax.random.normal(kb1, (N, 2, 3), dtype=jnp.float32) * 2.0
    b_fs = jax.random.randint(kb2, (N, 2, 2), minval=-3, maxval=4).astype(jnp.float32)
    b_codes = (jax.random.randint(kb3, (N, 2, 1), minval=1, maxval=8) * 100).astype(jnp.float32)
    b_targets = jnp.concatenate([b_fs, b_codes], axis=2)

    b_loss = weighted_mse_loss_batched(b_inputs, b_targets, weights)
    jax.block_until_ready(b_loss)
    b_ref = jax.vmap(lambda x, t: _reference_single(x, t, weights))(b_inputs, b_targets)
    assert jnp.allclose(b_loss, b_ref, atol=1e-5, rtol=1e-5), (b_loss[:4], b_ref[:4])

    print("KERNEL_OK")
</pallas_src>

<mosaic_0001>
module attributes {stable_mosaic.version = 11 : i64} {
  func.func @_wmse_scalar_kernel(%arg0: memref<19xf32, #tpu.memory_space<smem>>, %arg1: memref<1xf32, #tpu.memory_space<smem>>) attributes {dimension_semantics = [], scalar_prefetch = 0 : i64, scratch_operands = 0 : i64, tpu.core_type = #tpu.core_type<tc>} {
    %c0 = arith.constant 0 : index
    %0 = memref.load %arg0[%c0] : memref<19xf32, #tpu.memory_space<smem>>
    %c6 = arith.constant 6 : index
    %1 = memref.load %arg0[%c6] : memref<19xf32, #tpu.memory_space<smem>>
    %2 = arith.fptosi %1 : f32 to i32
    %3 = arith.sitofp %2 : i32 to f32
    %4 = arith.subf %0, %3 : f32
    %c1 = arith.constant 1 : index
    %5 = memref.load %arg0[%c1] : memref<19xf32, #tpu.memory_space<smem>>
    %c7 = arith.constant 7 : index
    %6 = memref.load %arg0[%c7] : memref<19xf32, #tpu.memory_space<smem>>
    %7 = arith.fptosi %6 : f32 to i32
    %8 = arith.sitofp %7 : i32 to f32
    %9 = arith.subf %5, %8 : f32
    %c3 = arith.constant 3 : index
    %10 = memref.load %arg0[%c3] : memref<19xf32, #tpu.memory_space<smem>>
    %c9 = arith.constant 9 : index
    %11 = memref.load %arg0[%c9] : memref<19xf32, #tpu.memory_space<smem>>
    %12 = arith.fptosi %11 : f32 to i32
    %13 = arith.sitofp %12 : i32 to f32
    %14 = arith.subf %10, %13 : f32
    %c4 = arith.constant 4 : index
    %15 = memref.load %arg0[%c4] : memref<19xf32, #tpu.memory_space<smem>>
    %c10 = arith.constant 10 : index
    %16 = memref.load %arg0[%c10] : memref<19xf32, #tpu.memory_space<smem>>
    %17 = arith.fptosi %16 : f32 to i32
    %18 = arith.sitofp %17 : i32 to f32
    %19 = arith.subf %15, %18 : f32
    %c2 = arith.constant 2 : index
    %20 = memref.load %arg0[%c2] : memref<19xf32, #tpu.memory_space<smem>>
    %c8 = arith.constant 8 : index
    %21 = memref.load %arg0[%c8] : memref<19xf32, #tpu.memory_space<smem>>
    %22 = arith.fptosi %21 : f32 to i32
    %23 = arith.sitofp %22 : i32 to f32
    %24 = arith.subf %20, %23 : f32
    %c5 = arith.constant 5 : index
    %25 = memref.load %arg0[%c5] : memref<19xf32, #tpu.memory_space<smem>>
    %c11 = arith.constant 11 : index
    %26 = memref.load %arg0[%c11] : memref<19xf32, #tpu.memory_space<smem>>
    %27 = arith.fptosi %26 : f32 to i32
    %28 = arith.sitofp %27 : i32 to f32
    %29 = arith.subf %25, %28 : f32
    %c8_0 = arith.constant 8 : index
    %30 = memref.load %arg0[%c8_0] : memref<19xf32, #tpu.memory_space<smem>>
    %cst = arith.constant 0.00999999977 : f32
    %31 = arith.mulf %30, %cst : f32
    %cst_1 = arith.constant 5.000000e-01 : f32
    %32 = arith.addf %31, %cst_1 : f32
    %33 = arith.fptosi %32 : f32 to i32
    %c1_i32 = arith.constant 1 : i32
    %34 = arith.subi %33, %c1_i32 : i32
    %c11_2 = arith.constant 11 : index
    %35 = memref.load %arg0[%c11_2] : memref<19xf32, #tpu.memory_space<smem>>
    %cst_3 = arith.constant 0.00999999977 : f32
    %36 = arith.mulf %35, %cst_3 : f32
    %cst_4 = arith.constant 5.000000e-01 : f32
    %37 = arith.addf %36, %cst_4 : f32
    %38 = arith.fptosi %37 : f32 to i32
    %c1_i32_5 = arith.constant 1 : i32
    %39 = arith.subi %38, %c1_i32_5 : i32
    %c12_i32 = arith.constant 12 : i32
    %40 = arith.addi %c12_i32, %34 : i32
    %41 = arith.index_cast %40 : i32 to index
    %42 = memref.load %arg0[%41] : memref<19xf32, #tpu.memory_space<smem>>
    %c12_i32_6 = arith.constant 12 : i32
    %43 = arith.addi %c12_i32_6, %39 : i32
    %44 = arith.index_cast %43 : i32 to index
    %45 = memref.load %arg0[%44] : memref<19xf32, #tpu.memory_space<smem>>
    %46 = arith.mulf %4, %4 : f32
    %47 = arith.mulf %14, %14 : f32
    %48 = arith.addf %46, %47 : f32
    %49 = arith.mulf %42, %48 : f32
    %50 = arith.mulf %9, %9 : f32
    %51 = arith.mulf %19, %19 : f32
    %52 = arith.addf %50, %51 : f32
    %53 = arith.mulf %45, %52 : f32
    %54 = arith.addf %49, %53 : f32
    %cst_7 = arith.constant 2.500000e-01 : f32
    %55 = arith.mulf %54, %cst_7 : f32
    %56 = arith.mulf %42, %24 : f32
    %57 = arith.mulf %56, %24 : f32
    %58 = arith.mulf %45, %29 : f32
    %59 = arith.mulf %58, %29 : f32
    %60 = arith.addf %57, %59 : f32
    %cst_8 = arith.constant 5.000000e-01 : f32
    %61 = arith.mulf %60, %cst_8 : f32
    %62 = arith.addf %55, %61 : f32
    %c0_9 = arith.constant 0 : index
    %63 = memref.load %arg1[%c0_9] : memref<1xf32, #tpu.memory_space<smem>>
    memref.store %62, %arg1[%c0_9] : memref<1xf32, #tpu.memory_space<smem>>
    return
  }
}

</mosaic_0001>

<bundles_post_ra>
// kernel: tpu_custom_call.1
= control target key start
LH: loop header
LB: loop body
LE: loop exit
PB: predicated region body
PF: predicated region fallthrough
CT: control target
= control target key end

     0   :  { %6 = vsyncpa [#allocation3], 0  ;;  %s208_s0 = inlined_call_operand.hbm [shape: f32[19], index: 0, kind: input, shape index: {}]   ;;  %s209_s1 = inlined_call_operand.hbm [shape: f32[1], index: 1, kind: output, shape index: {}]  }
   0x1   :  { %7 = vsyncpa [#allocation4], 0  ;;  %s166_s6 = smov [#allocation2]  }
   0x2   :  { %15 = dma.hbm_to_smem %s208_s0, 16, %s166_s6, [#allocation3]  }
   0x3   :  { %162 = dma.done.wait [#allocation3], 16  }
   0x4   :  { %163 = vsyncadd [#allocation3], 4294967280 }
   0x5   :  { %19 = sfence }
   0x6   :  { %s93_s9 = sld [smem:[#allocation2 + $0x6]] }
   0x7   :  { %s95_s10 = sld [smem:[#allocation2 + $0x7]] }
   0x8   :  { %s20_s11 = sld [smem:[#allocation2]] }
   0x9   :  { %s97_s12 = sld [smem:[#allocation2 + $0x9]] }
   0xa   :  { %s181_s13 = sld [smem:[#allocation2 + $0x1]] }
   0xb   :  { %s99_s16 = sld [smem:[#allocation2 + $0xa]] }
   0xc   :  { %p104_p0 = scmp.lt.s32.totalorder %s93_s9, 0  ;;  %s105_s14 = sceil.f32 %s93_s9 }
   0xd   :  { %s106_s15 = sfloor.f32 %s93_s9  ;;  %p109_p1 = scmp.lt.s32.totalorder %s95_s10, 0 }
   0xe   :  { %s211_s14 = smov (!%p104_p0, %s105_s14), %s106_s15  ;;  %s110_s17 = sceil.f32 %s95_s10 }
   0xf   :  { %s108_s18 = scvt.f32.s32 %s211_s14  ;;  %s111_s19 = sfloor.f32 %s95_s10 }
  0x10   :  { %s213_s17 = smov (!%p109_p1, %s110_s17), %s111_s19  ;;  %s96_s0 = sld [smem:[#allocation2 + $0x3]] }
  0x11   :  { %p114_p2 = scmp.lt.s32.totalorder %s97_s12, 0  ;;  %s113_s20 = scvt.f32.s32 %s213_s17 }
  0x12   :  { %s115_s21 = sceil.f32 %s97_s12  ;;  %s116_s22 = sfloor.f32 %s97_s12 }
  0x13   :  { %s183_s23 = sld [smem:[#allocation2 + $0x4]]  ;;  %s23_s24 = scvt.s32.f32 %s108_s18 }
  0x14   :  { %p119_p3 = scmp.lt.s32.totalorder %s99_s16, 0  ;;  %s215_s21 = smov (!%p114_p2, %s115_s21), %s116_s22 }
  0x15   :  { %s28_s25 = scvt.s32.f32 %s113_s20  ;;  %s120_s26 = sceil.f32 %s99_s16 }
  0x16   :  { %s118_s27 = scvt.f32.s32 %s215_s21  ;;  %s121_s28 = sfloor.f32 %s99_s16 }
  0x17   :  { %s217_s26 = smov (!%p119_p3, %s120_s26), %s121_s28  ;;  %s185_s29 = ssub.f32 %s20_s11, %s23_s24 }
  0x18   :  { %s101_s30 = sld [smem:[#allocation2 + $0x8]]  ;;  %s33_s2 = scvt.s32.f32 %s118_s27 }
  0x19   :  { %s123_s3 = scvt.f32.s32 %s217_s26  ;;  %s188_s4 = ssub.f32 %s181_s13, %s28_s25 }
  0x1a   :  { %s103_s5 = sld [smem:[#allocation2 + $0xb]]  ;;  %s60_s16 = smul.f32 %s185_s29, %s185_s29 }
  0x1b   :  { %s190_s6 = sld [smem:[#allocation2 + $0x2]]  ;;  %s38_s8 = scvt.s32.f32 %s123_s3 }
  0x1c   :  { %s192_s7 = ssub.f32 %s96_s0, %s33_s2  ;;  %s64_s25 = smul.f32 %s188_s4, %s188_s4 }
  0x1d   :  { %s194_s14 = sld [smem:[#allocation2 + $0x5]] }
  0x1e   :  { %p124_p4 = scmp.lt.s32.totalorder %s101_s30, 0  ;;  %s125_s9 = sceil.f32 %s101_s30 }
  0x1f   :  { %s126_s10 = sfloor.f32 %s101_s30  ;;  %s50_s12 = smul.f32 0.01, %s101_s30 }
  0x20   :  { %s219_s9 = smov (!%p124_p4, %s125_s9), %s126_s10  ;;  %p129_p5 = scmp.lt.s32.totalorder %s103_s5, 0 }
  0x21   :  { %s130_s11 = sceil.f32 %s103_s5  ;;  %s131_s13 = sfloor.f32 %s103_s5 }
  0x22   :  { %s221_s11 = smov (!%p129_p5, %s130_s11), %s131_s13  ;;  %s51_s15 = sadd.f32 0.5, %s50_s12 }
  0x23   :  { %s128_s17 = scvt.f32.s32 %s219_s9  ;;  %s53_s18 = smul.f32 0.01, %s103_s5 }
  0x24   :  { %p134_p6 = scmp.lt.s32.totalorder %s51_s15, 0  ;;  %s61_s19 = smul.f32 %s192_s7, %s192_s7 }
  0x25   :  { %s39_s0 = ssub.f32 %s183_s23, %s38_s8  ;;  %s135_s20 = sceil.f32 %s51_s15 }
  0x26   :  { %s136_s21 = sfloor.f32 %s51_s15  ;;  %s54_s22 = sadd.f32 0.5, %s53_s18 }
  0x27   :  { %s43_s24 = scvt.s32.f32 %s128_s17  ;;  %s223_s20 = smov (!%p134_p6, %s135_s20), %s136_s21 }
  0x28   :  { %p139_p7 = scmp.lt.s32.totalorder %s54_s22, 0  ;;  %s140_s26 = sceil.f32 %s54_s22 }
  0x29   :  { %s138_s27 = scvt.f32.s32 %s223_s20  ;;  %s141_s28 = sfloor.f32 %s54_s22 }
  0x2a   :  { %s225_s26 = smov (!%p139_p7, %s140_s26), %s141_s28  ;;  %s133_s29 = scvt.f32.s32 %s221_s11 }
  0x2b   :  { %s56_s30 = sadd.s32 11, %s138_s27  ;;  %s143_s2 = scvt.f32.s32 %s225_s26 }
  0x2c   :  { %s57_s3 = sld [smem:[#allocation2 + %s56_s30]]  ;;  %s65_s5 = smul.f32 %s39_s0, %s39_s0 }
  0x2d   :  { %s58_s23 = sadd.s32 11, %s143_s2  ;;  %s62_s7 = sadd.f32 %s61_s19, %s60_s16 }
  0x2e   :  { %s48_s8 = scvt.s32.f32 %s133_s29  ;;  %s59_s9 = sld [smem:[#allocation2 + %s58_s23]] }
  0x2f   :  { %s44_s10 = ssub.f32 %s190_s6, %s43_s24  ;;  %s167_s0 = smov [#allocation5]  }
  0x30   :  { %s66_s12 = sadd.f32 %s65_s5, %s64_s25 }
  0x31   :  { %s49_s4 = ssub.f32 %s194_s14, %s48_s8 }
  0x32   :  { %s63_s13 = smul.f32 %s62_s7, %s57_s3 }
  0x33   :  { %s70_s15 = smul.f32 %s57_s3, %s44_s10 }
  0x34   :  { %s67_s17 = smul.f32 %s66_s12, %s59_s9 }
  0x35   :  { %s72_s18 = smul.f32 %s59_s9, %s49_s4 }
  0x36   :  { %s68_s21 = sadd.f32 %s67_s17, %s63_s13  ;;  %s71_s20 = smul.f32 %s70_s15, %s44_s10 }
  0x37   :  { %s73_s22 = smul.f32 %s72_s18, %s49_s4 }
  0x38   :  { %s69_s28 = smul.f32 0.25, %s68_s21 }
  0x39   :  { %s74_s11 = sadd.f32 %s73_s22, %s71_s20 }
  0x3b   :  { %s75_s27 = smul.f32 0.5, %s74_s11 }
  0x3d   :  { %s76_s26 = sadd.f32 %s75_s27, %s69_s28 }
  0x3f   :  { %78 = sst [smem:[#allocation5]] %s76_s26 }
  0x40   :  { %86 = dma.smem_to_hbm %s167_s0, 16, %s209_s1, [#allocation4]  }
  0x41   :  { %164 = dma.done.wait [#allocation4], 16  }
  0x42   :  { %165 = vsyncadd [#allocation4], 4294967280 }
  0x43   :  { %90 = sfence }
  0x44   :  { %91 = vsyncpa [#allocation3], 1 }
  0x45   :  { %92 = vsyncpa [#allocation4], 1 }

</bundles_post_ra>
